<compile_context>
chip_gen: v5e
topology: v5e:2x2
jax: 0.10.0
libtpu: 0.0.40
codegen_flags: <defaults>
</compile_context>

<pallas_src>
import functools

import jax
import jax.numpy as jnp
from jax import lax
from jax.experimental import pallas as pl
from jax.experimental.pallas import tpu as pltpu


def _rbf_kernel_body(scale_ref, x_ref, x1_ref, xx_ref, yy_ref, o_ref):
    """One (tn, tm) tile of the pairwise Gaussian kernel matrix.

    scale_ref : SMEM (1,)  float32   precomputed -1 / (2 h^2)
    x_ref     : VMEM (tn, D)  float32
    x1_ref    : VMEM (tm, D)  float32
    xx_ref    : VMEM (tn, 1)  float32   precomputed ||x_i||^2
    yy_ref    : VMEM (1, tm)  float32   precomputed ||x1_j||^2
    o_ref     : VMEM (tn, tm)
    """
    # Cross term on the MXU: x @ x1^T via dot_general (NT contraction, no
    # in-kernel transpose needed).
    xy = lax.dot_general(
        x_ref[...], x1_ref[...],
        dimension_numbers=(((1,), (1,)), ((), ())),
        preferred_element_type=jnp.float32,
    )                                                   # (tn, tm)
    d2 = xx_ref[...] + yy_ref[...] - 2.0 * xy           # broadcast adds (VPU)
    d2 = jnp.maximum(d2, 0.0)                           # clamp fp round-off
    o_ref[...] = jnp.exp(d2 * scale_ref[0]).astype(o_ref.dtype)


def _round_up(a, b):
    return ((a + b - 1) // b) * b


@functools.partial(jax.jit, static_argnames=("tn", "tm", "out_dtype"))
def gaussian_kernel_matrix(x, x1, h, *, tn=256, tm=1024, out_dtype=jnp.float32):
    """K[i, j] = exp(-||x_i - x1_j||^2 / (2 h^2)) for x:[N,D], x1:[M,D].

    `out_dtype=jnp.bfloat16` halves output writeback bytes (values are in
    [0, 1]) if the caller can tolerate it; default keeps float32 semantics.
    """
    N, D = x.shape
    M, D1 = x1.shape
    assert D == D1, "feature dims must match"

    x = x.astype(jnp.float32)
    x1 = x1.astype(jnp.float32)

    # Tile sizes: sublane-aligned rows, lane-dense (>=128) output columns.
    tn_eff = min(tn, _round_up(N, 8))
    tm_eff = max(128, min(tm, _round_up(M, 128)))

    # Pad to tile multiples (padded rows are sliced off at the end).
    Np = _round_up(N, tn_eff)
    Mp = _round_up(M, tm_eff)
    if Np != N:
        x = jnp.pad(x, ((0, Np - N), (0, 0)))
    if Mp != M:
        x1 = jnp.pad(x1, ((0, Mp - M), (0, 0)))

    # Hoisted row norms (computed once here instead of once per output tile).
    xx = jnp.sum(x * x, axis=-1, keepdims=True)          # (Np, 1)
    yy = jnp.sum(x1 * x1, axis=-1)[None, :]              # (1, Mp)

    # Hoisted scalar: -1 / (2 h^2).
    h32 = jnp.asarray(h, dtype=jnp.float32)
    scale = (-0.5 / (h32 * h32)).reshape((1,))

    grid = (Np // tn_eff, Mp // tm_eff)
    out = pl.pallas_call(
        _rbf_kernel_body,
        out_shape=jax.ShapeDtypeStruct((Np, Mp), out_dtype),
        grid_spec=pltpu.PrefetchScalarGridSpec(
            num_scalar_prefetch=0,
            grid=grid,
            in_specs=[
                # -1/(2h^2) scalar lives in SMEM, same for every grid point.
                pl.BlockSpec(memory_space=pltpu.SMEM),
                pl.BlockSpec((tn_eff, D), lambda i, j: (i, 0)),
                pl.BlockSpec((tm_eff, D), lambda i, j: (j, 0)),
                pl.BlockSpec((tn_eff, 1), lambda i, j: (i, 0)),
                pl.BlockSpec((1, tm_eff), lambda i, j: (0, j)),
            ],
            out_specs=pl.BlockSpec((tn_eff, tm_eff), lambda i, j: (i, j)),
        ),
        compiler_params=pltpu.CompilerParams(
            dimension_semantics=("parallel", "parallel"),
            vmem_limit_bytes=48 * 1024 * 1024,
        ),
    )(scale, x, x1, xx, yy)

    if Np != N or Mp != M:
        out = out[:N, :M]
    return out


class KernelJAX:
    """JAX/Pallas port of the PyTorch `Kernel` module (Gaussian kernel)."""

    def __init__(self, h):
        self.h = float(h)

    def set_bandwidth(self, h):
        self.h = float(h)

    def get_bandwidth(self):
        return self.h

    def __call__(self, x, x1):
        return gaussian_kernel_matrix(x, x1, self.h)


def _reference(x, x1, h):
    d2 = jnp.sum((x[:, None, :] - x1[None, :, :]) ** 2, axis=-1)
    return jnp.exp(-d2 / (2.0 * h * h))


if __name__ == "__main__":
    key = jax.random.PRNGKey(0)
    k1, k2 = jax.random.split(key)

    # Small, deliberately non-tile-multiple shapes to exercise the padding path.
    N, M, D = 200, 192, 32
    x = jax.random.normal(k1, (N, D), dtype=jnp.float32)
    x1 = jax.random.normal(k2, (M, D), dtype=jnp.float32)

    bandwidth = 0.75                # deterministic "parameter" init
    mod = KernelJAX(bandwidth)

    out = mod(x, x1)
    out = jax.block_until_ready(out)

    ref = _reference(x, x1, bandwidth)
    assert out.shape == (N, M)
    assert jnp.allclose(out, ref, atol=1e-4, rtol=1e-4), "mismatch vs reference"

    print("KERNEL_OK")
</pallas_src>

<mosaic_0001>
module attributes {stable_mosaic.version = 11 : i64} {
  func.func @_rbf_kernel_body(%arg0: i32, %arg1: i32, %arg2: memref<1xf32, #tpu.memory_space<smem>>, %arg3: memref<200x32xf32, #tpu.memory_space<vmem>>, %arg4: memref<256x32xf32, #tpu.memory_space<vmem>>, %arg5: memref<200x1xf32, #tpu.memory_space<vmem>>, %arg6: memref<1x256xf32, #tpu.memory_space<vmem>>, %arg7: memref<200x256xf32, #tpu.memory_space<vmem>>) attributes {dimension_semantics = [#tpu.dimension_semantics<parallel>, #tpu.dimension_semantics<parallel>], iteration_bounds = array<i64: 1, 1>, scalar_prefetch = 0 : i64, scratch_operands = 0 : i64, tpu.core_type = #tpu.core_type<tc>, window_params = [{transform_indices = @transform_0, window_bounds = array<i64: 1>}, {transform_indices = @transform_1, window_bounds = array<i64: 200, 32>}, {transform_indices = @transform_2, window_bounds = array<i64: 256, 32>}, {transform_indices = @transform_3, window_bounds = array<i64: 200, 1>}, {transform_indices = @transform_4, window_bounds = array<i64: 1, 256>}, {transform_indices = @transform_5, window_bounds = array<i64: 200, 256>}]} {
    %c0 = arith.constant 0 : index
    %c0_0 = arith.constant 0 : index
    %0 = vector.load %arg3[%c0, %c0_0] : memref<200x32xf32, #tpu.memory_space<vmem>>, vector<200x32xf32>
    %c0_1 = arith.constant 0 : index
    %c0_2 = arith.constant 0 : index
    %1 = vector.load %arg4[%c0_1, %c0_2] : memref<256x32xf32, #tpu.memory_space<vmem>>, vector<256x32xf32>
    %cst = arith.constant dense<0.000000e+00> : vector<200x256xf32>
    %2 = tpu.matmul %0, %1, %cst {dimension_numbers = #tpu.dot_dimension_numbers<[1], [1], [0], [0], [0, 0, 1, 0], [], []>} : vector<200x32xf32>, vector<256x32xf32>, vector<200x256xf32> -> vector<200x256xf32>
    %c0_3 = arith.constant 0 : index
    %c0_4 = arith.constant 0 : index
    %3 = vector.load %arg5[%c0_3, %c0_4] : memref<200x1xf32, #tpu.memory_space<vmem>>, vector<200x1xf32>
    %c0_5 = arith.constant 0 : index
    %c0_6 = arith.constant 0 : index
    %4 = vector.load %arg6[%c0_5, %c0_6] : memref<1x256xf32, #tpu.memory_space<vmem>>, vector<1x256xf32>
    %5 = vector.broadcast %3 : vector<200x1xf32> to vector<200x256xf32>
    %6 = vector.broadcast %4 : vector<1x256xf32> to vector<200x256xf32>
    %7 = arith.addf %5, %6 : vector<200x256xf32>
    %cst_7 = arith.constant 2.000000e+00 : f32
    %8 = vector.broadcast %cst_7 : f32 to vector<200x256xf32>
    %9 = arith.mulf %8, %2 : vector<200x256xf32>
    %10 = arith.subf %7, %9 : vector<200x256xf32>
    %cst_8 = arith.constant 0.000000e+00 : f32
    %11 = vector.broadcast %cst_8 : f32 to vector<200x256xf32>
    %12 = arith.maximumf %10, %11 : vector<200x256xf32>
    %c0_9 = arith.constant 0 : index
    %13 = memref.load %arg2[%c0_9] : memref<1xf32, #tpu.memory_space<smem>>
    %14 = vector.broadcast %13 : f32 to vector<200x256xf32>
    %15 = arith.mulf %12, %14 : vector<200x256xf32>
    %16 = math.exp %15 : vector<200x256xf32>
    %c0_10 = arith.constant 0 : index
    %c0_11 = arith.constant 0 : index
    %17 = vector.load %arg7[%c0_10, %c0_11] : memref<200x256xf32, #tpu.memory_space<vmem>>, vector<200x256xf32>
    tpu.vector_store %arg7[%c0_10, %c0_11], %16 {strides = array<i32>} : memref<200x256xf32, #tpu.memory_space<vmem>>, vector<200x256xf32>,
    return
  }
  func.func @transform_0(%arg0: i32, %arg1: i32) -> i32 {
    %c0_i32 = arith.constant 0 : i32
    %c0_i32_0 = arith.constant 0 : i32
    return %c0_i32 : i32
  }
  func.func @transform_1(%arg0: i32, %arg1: i32) -> (i32, i32) {
    %c0_i32 = arith.constant 0 : i32
    %c0_i32_0 = arith.constant 0 : i32
    return %arg0, %c0_i32 : i32, i32
  }
  func.func @transform_2(%arg0: i32, %arg1: i32) -> (i32, i32) {
    %c0_i32 = arith.constant 0 : i32
    %c0_i32_0 = arith.constant 0 : i32
    return %arg1, %c0_i32 : i32, i32
  }
  func.func @transform_3(%arg0: i32, %arg1: i32) -> (i32, i32) {
    %c0_i32 = arith.constant 0 : i32
    %c0_i32_0 = arith.constant 0 : i32
    return %arg0, %c0_i32 : i32, i32
  }
  func.func @transform_4(%arg0: i32, %arg1: i32) -> (i32, i32) {
    %c0_i32 = arith.constant 0 : i32
    %c0_i32_0 = arith.constant 0 : i32
    return %c0_i32, %arg1 : i32, i32
  }
  func.func @transform_5(%arg0: i32, %arg1: i32) -> (i32, i32) {
    %c0_i32 = arith.constant 0 : i32
    return %arg0, %arg1 : i32, i32
  }
}

</mosaic_0001>

<bundles_post_ra>
// kernel: gaussian_kernel_matrix.1
= control target key start
LH: loop header
LB: loop body
LE: loop exit
PB: predicated region body
PF: predicated region fallthrough
CT: control target
= control target key end

     0   :  { %vm78_vm0 = vcmask 261120   ;;  %v1214_v11 = vmov 0   ;;  %s1915_s2 = inlined_call_operand.vmem [shape: f32[256,32], index: 2, kind: input, shape index: {}]   ;;  %s1916_s3 = inlined_call_operand.vmem [shape: f32[200,1], index: 3, kind: input, shape index: {}]   ;;  %s1917_s1 = inlined_call_operand.vmem [shape: f32[200,32], index: 1, kind: input, shape index: {}]   ;;  %s1918_s4 = inlined_call_operand.vmem [shape: f32[1,256], index: 4, kind: input, shape index: {}]   ;;  %s1919_s0 = inlined_call_operand.<no memory space> [shape: f32[1], index: 0, kind: input, shape index: {}]   ;;  %s1920_s5 = inlined_call_operand.vmem [shape: f32[200,256], index: 5, kind: output, shape index: {}]  }
   0x1   :  { %v61_v0 = vld [vmem:[%s1915_s2 + $0x78] sm:$0xff]  ;;  %v60_v2 = vld [vmem:[%s1915_s2 + $0x70] sm:$0xff]  ;;  %v59_v4 = vld [vmem:[%s1915_s2 + $0x68] sm:$0xff]  ;;  %1111 = vset.pattern.permute.xlu0 %v1214_v11  ;;  %1112 = vset.pattern.permute.xlu1 %v1214_v11 }
   0x2   :  { %v77_v1 = vld [vmem:[%s1915_s2 + $0xf8] sm:$0xff]  ;;  %996 = vmatpush.xpose.msk.msra.mxu0 %vm78_vm0, %v61_v0  ;;  %1078 = vmatpush.xpose.msk.msra.mxu2 %vm78_vm0, %v61_v0  ;;  %v76_v3 = vld [vmem:[%s1915_s2 + $0xf0] sm:$0xff]  ;;  %v75_v5 = vld [vmem:[%s1915_s2 + $0xe8] sm:$0xff] }
   0x3   :  { %1037 = vmatpush.xpose.msk.msra.mxu1 %vm78_vm0, %v77_v1  ;;  %1094 = vmatpush.xpose.msk.msra.mxu3 %vm78_vm0, %v77_v1  ;;  %v58_v6 = vld [vmem:[%s1915_s2 + $0x60] sm:$0xff]  ;;  %v57_v8 = vld [vmem:[%s1915_s2 + $0x58] sm:$0xff]  ;;  %v56_v12 = vld [vmem:[%s1915_s2 + $0x50] sm:$0xff] }
   0x4   :  { %v74_v7 = vld [vmem:[%s1915_s2 + $0xe0] sm:$0xff]  ;;  %v73_v10 = vld [vmem:[%s1915_s2 + $0xd8] sm:$0xff]  ;;  %1113 = vset.pattern.permute.xlu2 %v1214_v11  ;;  %v72_v13 = vld [vmem:[%s1915_s2 + $0xd0] sm:$0xff] }
   0x5   :  { %v434_v9 = vld [vmem:[%s1916_s3] sm:$0xff]  ;;  %v55_v14 = vld [vmem:[%s1915_s2 + $0x48] sm:$0xff]  ;;  %v436_v15 = vld [vmem:[%s1916_s3 + $0x10] sm:$0xff] }
   0x6   :  { %997 = vmatpush.xpose.msk.msra.mxu0 %vm78_vm0, %v60_v2  ;;  %1079 = vmatpush.xpose.msk.msra.mxu2 %vm78_vm0, %v60_v2  ;;  %v435_v16 = vld [vmem:[%s1916_s3 + $0x8] sm:$0xff]  ;;  %v54_v18 = vld [vmem:[%s1915_s2 + $0x40] sm:$0xff]  ;;  %v53_v20 = vld [vmem:[%s1915_s2 + $0x38] sm:$0xff] }
   0x7   :  { %1038 = vmatpush.xpose.msk.msra.mxu1 %vm78_vm0, %v76_v3  ;;  %1095 = vmatpush.xpose.msk.msra.mxu3 %vm78_vm0, %v76_v3  ;;  %v71_v17 = vld [vmem:[%s1915_s2 + $0xc8] sm:$0xff]  ;;  %v70_v19 = vld [vmem:[%s1915_s2 + $0xc0] sm:$0xff]  ;;  %v69_v21 = vld [vmem:[%s1915_s2 + $0xb8] sm:$0xff] }
   0x8   :  { %462 = vperm.xlu0 %1111, %v434_v9   ;;  %472 = vperm.xlu1 %1112, %v436_v15   ;;  %v437_v22 = vld [vmem:[%s1916_s3 + $0x18] sm:$0xff]  ;;  %v440_v23 = vld [vmem:[%s1916_s3 + $0x30] sm:$0xff]  ;;  %v51_v26 = vld [vmem:[%s1915_s2 + $0x28] sm:$0xff] }
   0x9   :  { %v52_v24 = vld [vmem:[%s1915_s2 + $0x30] sm:$0xff]  ;;  %v67_v27 = vld [vmem:[%s1915_s2 + $0xa8] sm:$0xff]  ;;  %v441_v28 = vld [vmem:[%s1916_s3 + $0x38] sm:$0xff] }
   0xa   :  { %998 = vmatpush.xpose.msk.msra.mxu0 %vm78_vm0, %v59_v4  ;;  %1080 = vmatpush.xpose.msk.msra.mxu2 %vm78_vm0, %v59_v4  ;;  %v68_v25 = vld [vmem:[%s1915_s2 + $0xb0] sm:$0xff]  ;;  %v443_v29 = vld [vmem:[%s1916_s3 + $0x48] sm:$0xff]  ;;  %v50_v30 = vld [vmem:[%s1915_s2 + $0x20] sm:$0xff] }
   0xb   :  { %1039 = vmatpush.xpose.msk.msra.mxu1 %vm78_vm0, %v75_v5  ;;  %1096 = vmatpush.xpose.msk.msra.mxu3 %vm78_vm0, %v75_v5  ;;  %v66_v31 = vld [vmem:[%s1915_s2 + $0xa0] sm:$0xff]  ;;  %v49_v32 = vld [vmem:[%s1915_s2 + $0x18] sm:$0xff]  ;;  %v444_v34 = vld [vmem:[%s1916_s3 + $0x50] sm:$0xff] }
   0xc   :  { %v65_v33 = vld [vmem:[%s1915_s2 + $0x98] sm:$0xff]  ;;  %v446_v35 = vld [vmem:[%s1916_s3 + $0x60] sm:$0xff]  ;;  %v48_v36 = vld [vmem:[%s1915_s2 + $0x10] sm:$0xff] }
   0xd   :  { %v64_v37 = vld [vmem:[%s1915_s2 + $0x90] sm:$0xff]  ;;  %v47_v38 = vld [vmem:[%s1915_s2 + $0x8] sm:$0xff]  ;;  %v438_v40 = vld [vmem:[%s1916_s3 + $0x20] sm:$0xff] }
   0xe   :  { %999 = vmatpush.xpose.msk.msra.mxu0 %vm78_vm0, %v58_v6  ;;  %1081 = vmatpush.xpose.msk.msra.mxu2 %vm78_vm0, %v58_v6  ;;  %v63_v39 = vld [vmem:[%s1915_s2 + $0x88] sm:$0xff]  ;;  %v449_v42 = vld [vmem:[%s1916_s3 + $0x78] sm:$0xff]  ;;  %v46_v43 = vld [vmem:[%s1915_s2] sm:$0xff] }
   0xf   :  { %1040 = vmatpush.xpose.msk.msra.mxu1 %vm78_vm0, %v74_v7  ;;  %1097 = vmatpush.xpose.msk.msra.mxu3 %vm78_vm0, %v74_v7  ;;  %v447_v41 = vld [vmem:[%s1916_s3 + $0x68] sm:$0xff]  ;;  %v62_v44 = vld [vmem:[%s1915_s2 + $0x80] sm:$0xff]  ;;  %v452_v49 = vld [vmem:[%s1916_s3 + $0x90] sm:$0xff] }
  0x10   :  { %467 = vperm.xlu0 %1111, %v435_v16   ;;  %477 = vperm.xlu1 %1112, %v437_v22   ;;  %v21_v45 = vld [vmem:[%s1917_s1] sm:$0xff]  ;;  %v34_v47 = vld [vmem:[%s1917_s1 + $0x68] sm:$0xff]  ;;  %v35_v51 = vld [vmem:[%s1917_s1 + $0x70] sm:$0xff] }
  0x11   :  { %482 = vperm.xlu2 %1113, %v438_v40   ;;  %v1445_v46 = vld [vmem:[%s1917_s1 + $0x60] sm:$0xff]  ;;  %v439_v48 = vld [vmem:[%s1916_s3 + $0x28] sm:$0xff]  ;;  %v23_v55 = vld [vmem:[%s1917_s1 + $0x10] sm:$0xff] }
  0x12   :  { %1000 = vmatpush.xpose.msk.msra.mxu0 %vm78_vm0, %v57_v8  ;;  %1082 = vmatpush.xpose.msk.msra.mxu2 %vm78_vm0, %v57_v8  ;;  %v22_v50 = vld [vmem:[%s1917_s1 + $0x8] sm:$0xff]  ;;  %v442_v52 = vld [vmem:[%s1916_s3 + $0x40] sm:$0xff]  ;;  %v36_v56 = vld [vmem:[%s1917_s1 + $0x78] sm:$0xff] }
  0x13   :  { %1041 = vmatpush.xpose.msk.msra.mxu1 %vm78_vm0, %v73_v10  ;;  %1098 = vmatpush.xpose.msk.msra.mxu3 %vm78_vm0, %v73_v10  ;;  %v450_v53 = vld [vmem:[%s1916_s3 + $0x80] sm:$0xff]  ;;  %v455_v54 = vld [vmem:[%s1916_s3 + $0xa8] sm:$0xff]  ;;  %v445_v57 = vld [vmem:[%s1916_s3 + $0x58] sm:$0xff] }
  0x14   :  { %v453_v58 = vld [vmem:[%s1916_s3 + $0x98] sm:$0xff]  ;;  %v458_v59 = vld [vmem:[%s1916_s3 + $0xc0] sm:$0xff]  ;;  %v448_v62 = vld [vmem:[%s1916_s3 + $0x70] sm:$0xff] }
  0x15   :  { %v24_v60 = vld [vmem:[%s1917_s1 + $0x18] sm:$0xff]  ;;  %v37_v61 = vld [vmem:[%s1917_s1 + $0x80] sm:$0xff]  ;;  %v456_v63 = vld [vmem:[%s1916_s3 + $0xb0] sm:$0xff] }
  0x16   :  { %1001 = vmatpush.xpose.msk.msra.mxu0 %vm78_vm0, %v56_v12  ;;  %1083 = vmatpush.xpose.msk.msra.mxu2 %vm78_vm0, %v56_v12  ;;  %v25_v0 = vld [vmem:[%s1917_s1 + $0x20] sm:$0xff]  ;;  %v38_v1 = vld [vmem:[%s1917_s1 + $0x88] sm:$0xff]  ;;  %v39_v4 = vld [vmem:[%s1917_s1 + $0x90] sm:$0xff] }
  0x17   :  { %1042 = vmatpush.xpose.msk.msra.mxu1 %vm78_vm0, %v72_v13  ;;  %1099 = vmatpush.xpose.msk.msra.mxu3 %vm78_vm0, %v72_v13  ;;  %v451_v2 = vld [vmem:[%s1916_s3 + $0x88] sm:$0xff]  ;;  %v454_v5 = vld [vmem:[%s1916_s3 + $0xa0] sm:$0xff]  ;;  %v27_v6 = vld [vmem:[%s1917_s1 + $0x30] sm:$0xff] }
  0x18   :  { %492 = vperm.xlu0 %1111, %v440_v23   ;;  %497 = vperm.xlu1 %1112, %v441_v28   ;;  %v26_v3 = vld [vmem:[%s1917_s1 + $0x28] sm:$0xff]  ;;  %v40_v7 = vld [vmem:[%s1917_s1 + $0x98] sm:$0xff]  ;;  %v41_v10 = vld [vmem:[%s1917_s1 + $0xa0] sm:$0xff] }
  0x19   :  { %487 = vperm.xlu2 %1113, %v439_v48   ;;  %v457_v8 = vld [vmem:[%s1916_s3 + $0xb8] sm:$0xff]  ;;  %v29_v11 = vld [vmem:[%s1917_s1 + $0x40] sm:$0xff]  ;;  %v42_v12 = vld [vmem:[%s1917_s1 + $0xa8] sm:$0xff] }
  0x1a   :  { %1002 = vmatpush.xpose.msk.msra.mxu0 %vm78_vm0, %v55_v14  ;;  %1084 = vmatpush.xpose.msk.msra.mxu2 %vm78_vm0, %v55_v14  ;;  %v28_v9 = vld [vmem:[%s1917_s1 + $0x38] sm:$0xff]  ;;  %v30_v13 = vld [vmem:[%s1917_s1 + $0x48] sm:$0xff]  ;;  %v43_v14 = vld [vmem:[%s1917_s1 + $0xb0] sm:$0xff] }
  0x1b   :  { %1043 = vmatpush.xpose.msk.msra.mxu1 %vm78_vm0, %v71_v17  ;;  %1100 = vmatpush.xpose.msk.msra.mxu3 %vm78_vm0, %v71_v17  ;;  %v31_v15 = vld [vmem:[%s1917_s1 + $0x50] sm:$0xff]  ;;  %v44_v16 = vld [vmem:[%s1917_s1 + $0xb8] sm:$0xff] }
  0x1c   :  { %v32_v17 = vld [vmem:[%s1917_s1 + $0x58] sm:$0xff] }
  0x1e   :  { %1003 = vmatpush.xpose.msk.msra.mxu0 %vm78_vm0, %v54_v18  ;;  %1085 = vmatpush.xpose.msk.msra.mxu2 %vm78_vm0, %v54_v18  ;;  %v45_v18 = vld [vmem:[%s1917_s1 + $0xc0] sm:$0xff] }
  0x1f   :  { %1044 = vmatpush.xpose.msk.msra.mxu1 %vm78_vm0, %v70_v19  ;;  %1101 = vmatpush.xpose.msk.msra.mxu3 %vm78_vm0, %v70_v19 }
  0x20   :  { %507 = vperm.xlu0 %1111, %v443_v29   ;;  %512 = vperm.xlu1 %1112, %v444_v34   ;;  %v459_v29 = vld [vmem:[%s1918_s4] sm:$0x3] }
  0x21   :  { %502 = vperm.xlu2 %1113, %v442_v52  }
  0x22   :  { %1004 = vmatpush.xpose.msk.msra.mxu0 %vm78_vm0, %v53_v20  ;;  %1086 = vmatpush.xpose.msk.msra.mxu2 %vm78_vm0, %v53_v20 }
  0x23   :  { %1045 = vmatpush.xpose.msk.msra.mxu1 %vm78_vm0, %v69_v21  ;;  %1102 = vmatpush.xpose.msk.msra.mxu3 %vm78_vm0, %v69_v21 }
  0x26   :  { %1005 = vmatpush.xpose.msk.msra.mxu0 %vm78_vm0, %v52_v24  ;;  %1087 = vmatpush.xpose.msk.msra.mxu2 %vm78_vm0, %v52_v24 }
  0x27   :  { %1046 = vmatpush.xpose.msk.msra.mxu1 %vm78_vm0, %v68_v25  ;;  %1103 = vmatpush.xpose.msk.msra.mxu3 %vm78_vm0, %v68_v25 }
  0x28   :  { %522 = vperm.xlu0 %1111, %v446_v35   ;;  %527 = vperm.xlu1 %1112, %v447_v41  }
  0x29   :  { %517 = vperm.xlu2 %1113, %v445_v57  }
  0x2a   :  { %1006 = vmatpush.xpose.msk.msra.mxu0 %vm78_vm0, %v51_v26  ;;  %1088 = vmatpush.xpose.msk.msra.mxu2 %vm78_vm0, %v51_v26 }
  0x2b   :  { %1047 = vmatpush.xpose.msk.msra.mxu1 %vm78_vm0, %v67_v27  ;;  %1104 = vmatpush.xpose.msk.msra.mxu3 %vm78_vm0, %v67_v27 }
  0x2e   :  { %1007 = vmatpush.xpose.msk.msra.mxu0 %vm78_vm0, %v50_v30  ;;  %1089 = vmatpush.xpose.msk.msra.mxu2 %vm78_vm0, %v50_v30 }
  0x2f   :  { %1048 = vmatpush.xpose.msk.msra.mxu1 %vm78_vm0, %v66_v31  ;;  %1105 = vmatpush.xpose.msk.msra.mxu3 %vm78_vm0, %v66_v31  ;;  %v1630_v31 = vperm.slane %v459_v29, 1 }
  0x30   :  { %537 = vperm.xlu0 %1111, %v449_v42   ;;  %542 = vperm.xlu1 %1112, %v450_v53  }
  0x31   :  { %532 = vperm.xlu2 %1113, %v448_v62  }
  0x32   :  { %1008 = vmatpush.xpose.msk.msra.mxu0 %vm78_vm0, %v49_v32  ;;  %1090 = vmatpush.xpose.msk.msra.mxu2 %vm78_vm0, %v49_v32  ;;  %v1632_v32 = vperm.slane %v459_v29, 0 }
  0x33   :  { %1049 = vmatpush.xpose.msk.msra.mxu1 %vm78_vm0, %v65_v33  ;;  %1106 = vmatpush.xpose.msk.msra.mxu3 %vm78_vm0, %v65_v33 }
  0x36   :  { %1009 = vmatpush.xpose.msk.msra.mxu0 %vm78_vm0, %v48_v36  ;;  %1091 = vmatpush.xpose.msk.msra.mxu2 %vm78_vm0, %v48_v36 }
  0x37   :  { %1050 = vmatpush.xpose.msk.msra.mxu1 %vm78_vm0, %v64_v37  ;;  %1107 = vmatpush.xpose.msk.msra.mxu3 %vm78_vm0, %v64_v37 }
  0x38   :  { %552 = vperm.xlu0 %1111, %v452_v49   ;;  %557 = vperm.xlu1 %1112, %v453_v58  }
  0x39   :  { %547 = vperm.xlu2 %1113, %v451_v2  }
  0x3a   :  { %1010 = vmatpush.xpose.msk.msra.mxu0 %vm78_vm0, %v47_v38  ;;  %1092 = vmatpush.xpose.msk.msra.mxu2 %vm78_vm0, %v47_v38 }
  0x3b   :  { %1051 = vmatpush.xpose.msk.msra.mxu1 %vm78_vm0, %v63_v39  ;;  %1108 = vmatpush.xpose.msk.msra.mxu3 %vm78_vm0, %v63_v39 }
  0x3e   :  { %1011 = vmatpush.xpose.msk.msra.mxu0 %vm78_vm0, %v46_v43  ;;  %1093 = vmatpush.xpose.msk.msra.mxu2 %vm78_vm0, %v46_v43 }
  0x3f   :  { %1052 = vmatpush.xpose.msk.msra.mxu1 %vm78_vm0, %v62_v44  ;;  %1109 = vmatpush.xpose.msk.msra.mxu3 %vm78_vm0, %v62_v44 }
  0x40   :  { %567 = vperm.xlu0 %1111, %v455_v54   ;;  %572 = vperm.xlu1 %1112, %v456_v63  }
  0x41   :  { %1012 = vmatmul.msk.f32.vlgmr.msra.gmra.mxu0 %vm78_vm0, %v21_v45  ;;  %1024 = vmatmul.msk.f32.vlgmr.msra.gmra.mxu2 %vm78_vm0, %v1445_v46 }
  0x42   :  { %1053 = vmatmul.msk.f32.vlgmr.msra.gmra.mxu1 %vm78_vm0, %v21_v45  ;;  %1066 = vmatmul.msk.f32.vlgmr.msra.gmra.mxu3 %vm78_vm0, %v34_v47  ;;  %v1643_v45 = vstv %s1919_s0 }
  0x43   :  { %562 = vperm.xlu2 %1113, %v454_v5  }
  0x48   :  { %582 = vperm.xlu0 %1111, %v458_v59  }
  0x49   :  { %1013 = vmatmul.msk.f32.gmra.mxu0 %vm78_vm0, %v22_v50  ;;  %1025 = vmatmul.msk.f32.gmra.mxu2 %vm78_vm0, %v34_v47 }
  0x4a   :  { %1054 = vmatmul.msk.f32.gmra.mxu1 %vm78_vm0, %v22_v50  ;;  %1067 = vmatmul.msk.f32.gmra.mxu3 %vm78_vm0, %v35_v51 }
  0x4b   :  { %577 = vperm.xlu2 %1113, %v457_v8  }
  0x51   :  { %1014 = vmatmul.msk.f32.gmra.mxu0 %vm78_vm0, %v23_v55  ;;  %1026 = vmatmul.msk.f32.gmra.mxu2 %vm78_vm0, %v35_v51 }
  0x52   :  { %1055 = vmatmul.msk.f32.gmra.mxu1 %vm78_vm0, %v23_v55  ;;  %1068 = vmatmul.msk.f32.gmra.mxu3 %vm78_vm0, %v36_v56 }
  0x59   :  { %1015 = vmatmul.msk.f32.gmra.mxu0 %vm78_vm0, %v24_v60  ;;  %1027 = vmatmul.msk.f32.gmra.mxu2 %vm78_vm0, %v36_v56 }
  0x5a   :  { %1056 = vmatmul.msk.f32.gmra.mxu1 %vm78_vm0, %v24_v60  ;;  %1069 = vmatmul.msk.f32.gmra.mxu3 %vm78_vm0, %v37_v61 }
  0x61   :  { %1016 = vmatmul.msk.f32.gmra.mxu0 %vm78_vm0, %v25_v0  ;;  %1028 = vmatmul.msk.f32.gmra.mxu2 %vm78_vm0, %v37_v61 }
  0x62   :  { %1057 = vmatmul.msk.f32.gmra.mxu1 %vm78_vm0, %v25_v0  ;;  %1070 = vmatmul.msk.f32.gmra.mxu3 %vm78_vm0, %v38_v1 }
  0x69   :  { %1017 = vmatmul.msk.f32.gmra.mxu0 %vm78_vm0, %v26_v3  ;;  %1029 = vmatmul.msk.f32.gmra.mxu2 %vm78_vm0, %v38_v1 }
  0x6a   :  { %1058 = vmatmul.msk.f32.gmra.mxu1 %vm78_vm0, %v26_v3  ;;  %1071 = vmatmul.msk.f32.gmra.mxu3 %vm78_vm0, %v39_v4 }
  0x6b   :  { %v1609_v21 = vpop.permute.xlu2 %482 }
  0x71   :  { %1018 = vmatmul.msk.f32.gmra.mxu0 %vm78_vm0, %v27_v6  ;;  %1030 = vmatmul.msk.f32.gmra.mxu2 %vm78_vm0, %v39_v4 }
  0x72   :  { %1059 = vmatmul.msk.f32.gmra.mxu1 %vm78_vm0, %v27_v6  ;;  %1072 = vmatmul.msk.f32.gmra.mxu3 %vm78_vm0, %v40_v7 }
  0x73   :  { %v1615_v24 = vpop.permute.xlu2 %487 }
  0x79   :  { %1019 = vmatmul.msk.f32.gmra.mxu0 %vm78_vm0, %v28_v9  ;;  %1031 = vmatmul.msk.f32.gmra.mxu2 %vm78_vm0, %v40_v7 }
  0x7a   :  { %1060 = vmatmul.msk.f32.gmra.mxu1 %vm78_vm0, %v28_v9  ;;  %1073 = vmatmul.msk.f32.gmra.mxu3 %vm78_vm0, %v41_v10  ;;  %v463_v19 = vpop.permute.xlu0 %462  ;;  %v1604_v20 = vpop.permute.xlu1 %472 }
  0x7b   :  { %v1621_v27 = vpop.permute.xlu2 %502  ;;  %v590_v33 = vadd.f32 %v1632_v32, %v463_v19  ;;  %v591_v34 = vadd.f32 %v1630_v31, %v463_v19 }
  0x81   :  { %1020 = vmatmul.msk.f32.gmra.mxu0 %vm78_vm0, %v29_v11  ;;  %1032 = vmatmul.msk.f32.gmra.mxu2 %vm78_vm0, %v41_v10 }
  0x82   :  { %1061 = vmatmul.msk.f32.gmra.mxu1 %vm78_vm0, %v29_v11  ;;  %1074 = vmatmul.msk.f32.gmra.mxu3 %vm78_vm0, %v42_v12  ;;  %v468_v22 = vpop.permute.xlu0 %467  ;;  %v1613_v23 = vpop.permute.xlu1 %477 }
  0x83   :  { %v1636_v38 = vpop.permute.xlu2 %517  ;;  %v592_v50 = vadd.f32 %v1632_v32, %v468_v22  ;;  %v593_v54 = vadd.f32 %v1630_v31, %v468_v22 }
  0x89   :  { %1021 = vmatmul.msk.f32.gmra.mxu0 %vm78_vm0, %v30_v13  ;;  %1033 = vmatmul.msk.f32.gmra.mxu2 %vm78_vm0, %v42_v12 }
  0x8a   :  { %1062 = vmatmul.msk.f32.gmra.mxu1 %vm78_vm0, %v30_v13  ;;  %1075 = vmatmul.msk.f32.gmra.mxu3 %vm78_vm0, %v43_v14  ;;  %v1617_v25 = vpop.permute.xlu0 %492  ;;  %v1619_v26 = vpop.permute.xlu1 %497  ;;  %v594_v13 = vadd.f32 %v1632_v32, %v1604_v20 }
  0x8b   :  { %v533_v3 = vpop.permute.xlu2 %532 }
  0x8c   :  { %v619_v12 = vadd.f32 %v1630_v31, %v533_v3 }
  0x91   :  { %1022 = vmatmul.msk.f32.gmra.mxu0 %vm78_vm0, %v31_v15  ;;  %1034 = vmatmul.msk.f32.gmra.mxu2 %vm78_vm0, %v43_v14 }
  0x92   :  { %1063 = vmatmul.msk.f32.gmra.mxu1 %vm78_vm0, %v31_v15  ;;  %1076 = vmatmul.msk.f32.gmra.mxu3 %vm78_vm0, %v44_v16  ;;  %v1623_v28 = vpop.permute.xlu0 %507  ;;  %v1628_v30 = vpop.permute.xlu1 %512 }
  0x99   :  { %1023 = vmatmul.msk.f32.gmra.mxu0 %vm78_vm0, %v32_v17  ;;  %1035 = vmatmul.msk.f32.gmra.mxu2 %vm78_vm0, %v44_v16 }
  0x9a   :  { %1064 = vmatmul.msk.f32.gmra.mxu1 %vm78_vm0, %v32_v17  ;;  %1077 = vmatmul.msk.f32.gmra.mxu3 %vm78_vm0, %v45_v18  ;;  %v1638_v40 = vpop.permute.xlu0 %522  ;;  %v528_v42 = vpop.permute.xlu1 %527 }
  0x9b   :  { %v617_v49 = vadd.f32 %v1630_v31, %v528_v42  ;;  %v616_v8 = vadd.f32 %v1632_v32, %v528_v42 }
  0xa1   :  { %1036 = vmatmul.msk.f32.gmra.mxu2 %vm78_vm0, %v45_v18  ;;  %v595_v18 = vadd.f32 %v1630_v31, %v1604_v20 }
  0xa2   :  { %1065 = vmatmul.msk.f32.gmra.mxu1 %vm78_vm0, %v1445_v46  ;;  %v614_v46 = vadd.f32 %v1632_v32, %v1638_v40 }
  0xbe   :  { %v267_v35 = vpop.f32.mrf.mxu0 }
  0xbf   :  { %v640_v36 = vmul.f32 2.0, %v267_v35  ;;  %v359_v37 = vpop.f32.mrf.mxu1 }
  0xc0   :  { %v641_v39 = vmul.f32 2.0, %v359_v37 }
  0xc1   :  { %v690_v41 = vsub.f32 %v590_v33, %v640_v36 }
  0xc2   :  { %v691_v43 = vsub.f32 %v591_v34, %v641_v39 }
  0xc3   :  { %v740_v44 = vmax.f32 %v690_v41, 0.0 }
  0xc4   :  { %v741_v47 = vmax.f32 %v691_v43, 0.0  ;;  %v303_v48 = vpop.f32.mrf.mxu2 }
  0xc5   :  { %v792_v51 = vmul.f32 %v1643_v45, %v740_v44  ;;  %v664_v52 = vmul.f32 2.0, %v303_v48  ;;  %v398_v53 = vpop.f32.mrf.mxu3 }
  0xc6   :  { %v793_v55 = vmul.f32 %v1643_v45, %v741_v47  ;;  %v667_v56 = vmul.f32 2.0, %v398_v53  ;;  %v270_v57 = vpop.f32.mrf.mxu0 }
  0xc7   :  { %v842_v58 = vmul.f32 1.442695, %v792_v51  ;;  %v714_v59 = vsub.f32 %v614_v46, %v664_v52  ;;  %v642_v60 = vmul.f32 2.0, %v270_v57  ;;  %v362_v61 = vpop.f32.mrf.mxu1  ;;  %v618_v52 = vadd.f32 %v1632_v32, %v533_v3 }
  0xc8   :  { %v844_v62 = vmul.f32 1.442695, %v793_v55  ;;  %v643_v63 = vmul.f32 2.0, %v362_v61  ;;  %v717_v0 = vsub.f32 %v617_v49, %v667_v56  ;;  %v538_v49 = vpop.permute.xlu0 %537 }
  0xc9   :  { %1114 = vpow2.f32 %v842_v58  ;;  %v764_v1 = vmax.f32 %v714_v59, 0.0  ;;  %v692_v2 = vsub.f32 %v592_v50, %v642_v60  ;;  %v621_v53 = vadd.f32 %v1630_v31, %v538_v49 }
  0xca   :  { %1116 = vpow2.f32 %v844_v62  ;;  %v693_v4 = vsub.f32 %v593_v54, %v643_v63  ;;  %v767_v5 = vmax.f32 %v717_v0, 0.0  ;;  %v596_v58 = vadd.f32 %v1632_v32, %v1613_v23 }
  0xcb   :  { %v816_v6 = vmul.f32 %v1643_v45, %v764_v1  ;;  %v742_v7 = vmax.f32 %v692_v2, 0.0  ;;  %v597_v0 = vadd.f32 %v1630_v31, %v1613_v23 }
  0xcc   :  { %v743_v9 = vmax.f32 %v693_v4, 0.0  ;;  %v819_v10 = vmul.f32 %v1643_v45, %v767_v5  ;;  %v306_v11 = vpop.f32.mrf.mxu2 }
  0xcd   :  { %v890_v14 = vmul.f32 1.442695, %v816_v6  ;;  %v794_v15 = vmul.f32 %v1643_v45, %v742_v7  ;;  %v666_v16 = vmul.f32 2.0, %v306_v11  ;;  %v401_v17 = vpop.f32.mrf.mxu3 }
  0xce   :  { %v795_v19 = vmul.f32 %v1643_v45, %v743_v9  ;;  %v896_v22 = vmul.f32 1.442695, %v819_v10  ;;  %v669_v29 = vmul.f32 2.0, %v401_v17  ;;  %v273_v33 = vpop.f32.mrf.mxu0  ;;  %v620_v17 = vadd.f32 %v1632_v32, %v538_v49 }
  0xcf   :  { %v1115_v34 = vpop.eup %1114  ;;  %1118 = vpow2.f32 %v890_v14  ;;  %v846_v35 = vmul.f32 1.442695, %v794_v15  ;;  %v716_v36 = vsub.f32 %v616_v8, %v666_v16  ;;  %v644_v37 = vmul.f32 2.0, %v273_v33  ;;  %v365_v39 = vpop.f32.mrf.mxu1 }
  0xd0   :  { %v1117_v41 = vpop.eup %1116  ;;  %942 = vst [vmem:[%s1920_s5] sm:$0xff] %v1115_v34  ;;  %v848_v42 = vmul.f32 1.442695, %v795_v19  ;;  %1120 = vpow2.f32 %v896_v22  ;;  %v645_v43 = vmul.f32 2.0, %v365_v39  ;;  %v719_v20 = vsub.f32 %v619_v12, %v669_v29  ;;  %v543_v22 = vpop.permute.xlu1 %542 }
  0xd1   :  { %943 = vst [vmem:[%s1920_s5 + $0x8] sm:$0xff] %v1117_v41  ;;  %1122 = vpow2.f32 %v846_v35  ;;  %v766_v44 = vmax.f32 %v716_v36, 0.0  ;;  %v694_v46 = vsub.f32 %v594_v13, %v644_v37  ;;  %v623_v34 = vadd.f32 %v1630_v31, %v543_v22 }
  0xd2   :  { %1124 = vpow2.f32 %v848_v42  ;;  %v695_v47 = vsub.f32 %v595_v18, %v645_v43  ;;  %v769_v48 = vmax.f32 %v719_v20, 0.0  ;;  %v598_v37 = vadd.f32 %v1632_v32, %v1609_v21 }
  0xd3   :  { %v818_v50 = vmul.f32 %v1643_v45, %v766_v44  ;;  %v744_v51 = vmax.f32 %v694_v46, 0.0  ;;  %v599_v44 = vadd.f32 %v1630_v31, %v1609_v21 }
  0xd4   :  { %v745_v54 = vmax.f32 %v695_v47, 0.0  ;;  %v821_v55 = vmul.f32 %v1643_v45, %v769_v48  ;;  %v309_v56 = vpop.f32.mrf.mxu2 }
  0xd5   :  { %v1119_v57 = vpop.eup %1118  ;;  %v894_v59 = vmul.f32 1.442695, %v818_v50  ;;  %v796_v60 = vmul.f32 %v1643_v45, %v744_v51  ;;  %v668_v61 = vmul.f32 2.0, %v309_v56  ;;  %v404_v62 = vpop.f32.mrf.mxu3 }
  0xd6   :  { %v1121_v63 = vpop.eup %1120  ;;  %966 = vst [vmem:[%s1920_s5 + $0xc0] sm:$0xff] %v1119_v57  ;;  %v797_v1 = vmul.f32 %v1643_v45, %v745_v54  ;;  %v900_v2 = vmul.f32 1.442695, %v821_v55  ;;  %v671_v3 = vmul.f32 2.0, %v404_v62  ;;  %v276_v4 = vpop.f32.mrf.mxu0 }
  0xd7   :  { %v1123_v5 = vpop.eup %1122  ;;  %969 = vst [vmem:[%s1920_s5 + $0xd8] sm:$0xff] %v1121_v63  ;;  %1126 = vpow2.f32 %v894_v59  ;;  %v850_v6 = vmul.f32 1.442695, %v796_v60  ;;  %v718_v7 = vsub.f32 %v618_v52, %v668_v61  ;;  %v646_v8 = vmul.f32 2.0, %v276_v4  ;;  %v368_v9 = vpop.f32.mrf.mxu1 }
  0xd8   :  { %v1125_v23 = vpop.eup %1124  ;;  %944 = vst [vmem:[%s1920_s5 + $0x10] sm:$0xff] %v1123_v5  ;;  %v852_v10 = vmul.f32 1.442695, %v797_v1  ;;  %1128 = vpow2.f32 %v900_v2  ;;  %v721_v11 = vsub.f32 %v621_v53, %v671_v3  ;;  %v647_v12 = vmul.f32 2.0, %v368_v9  ;;  %v548_v62 = vpop.permute.xlu2 %547 }
  0xd9   :  { %945 = vst [vmem:[%s1920_s5 + $0x18] sm:$0xff] %v1125_v23  ;;  %1130 = vpow2.f32 %v850_v6  ;;  %v768_v13 = vmax.f32 %v718_v7, 0.0  ;;  %v696_v14 = vsub.f32 %v596_v58, %v646_v8  ;;  %v622_v63 = vadd.f32 %v1632_v32, %v543_v22 }
  0xda   :  { %1132 = vpow2.f32 %v852_v10  ;;  %v771_v15 = vmax.f32 %v721_v11, 0.0  ;;  %v697_v16 = vsub.f32 %v597_v0, %v647_v12  ;;  %v625_v2 = vadd.f32 %v1630_v31, %v548_v62 }
  0xdb   :  { %v820_v18 = vmul.f32 %v1643_v45, %v768_v13  ;;  %v746_v19 = vmax.f32 %v696_v14, 0.0  ;;  %v600_v7 = vadd.f32 %v1632_v32, %v1615_v24  ;;  %v601_v12 = vadd.f32 %v1630_v31, %v1615_v24 }
  0xdc   :  { %v823_v29 = vmul.f32 %v1643_v45, %v771_v15  ;;  %v747_v33 = vmax.f32 %v697_v16, 0.0  ;;  %v312_v35 = vpop.f32.mrf.mxu2 }
  0xdd   :  { %v1127_v36 = vpop.eup %1126  ;;  %v898_v39 = vmul.f32 1.442695, %v820_v18  ;;  %v798_v41 = vmul.f32 %v1643_v45, %v746_v19  ;;  %v670_v42 = vmul.f32 2.0, %v312_v35  ;;  %v407_v43 = vpop.f32.mrf.mxu3 }
  0xde   :  { %v1129_v20 = vpop.eup %1128  ;;  %968 = vst [vmem:[%s1920_s5 + $0xd0] sm:$0xff] %v1127_v36  ;;  %v904_v46 = vmul.f32 1.442695, %v823_v29  ;;  %v799_v47 = vmul.f32 %v1643_v45, %v747_v33  ;;  %v673_v48 = vmul.f32 2.0, %v407_v43  ;;  %v279_v49 = vpop.f32.mrf.mxu0 }
  0xdf   :  { %v1131_v50 = vpop.eup %1130  ;;  %971 = vst [vmem:[%s1920_s5 + $0xe8] sm:$0xff] %v1129_v20  ;;  %1134 = vpow2.f32 %v898_v39  ;;  %v854_v51 = vmul.f32 1.442695, %v798_v41  ;;  %v720_v52 = vsub.f32 %v620_v17, %v670_v42  ;;  %v648_v53 = vmul.f32 2.0, %v279_v49  ;;  %v371_v54 = vpop.f32.mrf.mxu1 }
  0xe0   :  { %v1133_v21 = vpop.eup %1132  ;;  %946 = vst [vmem:[%s1920_s5 + $0x20] sm:$0xff] %v1131_v50  ;;  %1136 = vpow2.f32 %v904_v46  ;;  %v856_v55 = vmul.f32 1.442695, %v799_v47  ;;  %v723_v56 = vsub.f32 %v623_v34, %v673_v48  ;;  %v649_v57 = vmul.f32 2.0, %v371_v54 }
  0xe1   :  { %947 = vst [vmem:[%s1920_s5 + $0x28] sm:$0xff] %v1133_v21  ;;  %1138 = vpow2.f32 %v854_v51  ;;  %v770_v58 = vmax.f32 %v720_v52, 0.0  ;;  %v698_v59 = vsub.f32 %v598_v37, %v648_v53  ;;  %v624_v42 = vadd.f32 %v1632_v32, %v548_v62  ;;  %v553_v51 = vpop.permute.xlu0 %552 }
  0xe2   :  { %1140 = vpow2.f32 %v856_v55  ;;  %v773_v60 = vmax.f32 %v723_v56, 0.0  ;;  %v699_v61 = vsub.f32 %v599_v44, %v649_v57  ;;  %v602_v44 = vadd.f32 %v1632_v32, %v1617_v25 }
  0xe3   :  { %v822_v0 = vmul.f32 %v1643_v45, %v770_v58  ;;  %v748_v1 = vmax.f32 %v698_v59, 0.0  ;;  %v603_v50 = vadd.f32 %v1630_v31, %v1617_v25  ;;  %v627_v56 = vadd.f32 %v1630_v31, %v553_v51 }
  0xe4   :  { %v825_v3 = vmul.f32 %v1643_v45, %v773_v60  ;;  %v749_v4 = vmax.f32 %v699_v61, 0.0  ;;  %v315_v5 = vpop.f32.mrf.mxu2 }
  0xe5   :  { %v1135_v6 = vpop.eup %1134  ;;  %v902_v8 = vmul.f32 1.442695, %v822_v0  ;;  %v800_v9 = vmul.f32 %v1643_v45, %v748_v1  ;;  %v672_v23 = vmul.f32 2.0, %v315_v5  ;;  %v410_v10 = vpop.f32.mrf.mxu3 }
  0xe6   :  { %v1137_v11 = vpop.eup %1136  ;;  %970 = vst [vmem:[%s1920_s5 + $0xe0] sm:$0xff] %v1135_v6  ;;  %v908_v13 = vmul.f32 1.442695, %v825_v3  ;;  %v801_v14 = vmul.f32 %v1643_v45, %v749_v4  ;;  %v675_v15 = vmul.f32 2.0, %v410_v10  ;;  %v282_v16 = vpop.f32.mrf.mxu0  ;;  %v604_v10 = vadd.f32 %v1632_v32, %v1619_v26 }
  0xe7   :  { %v1139_v17 = vpop.eup %1138  ;;  %973 = vst [vmem:[%s1920_s5 + $0xf8] sm:$0xff] %v1137_v11  ;;  %1142 = vpow2.f32 %v902_v8  ;;  %v858_v18 = vmul.f32 1.442695, %v800_v9  ;;  %v722_v19 = vsub.f32 %v622_v63, %v672_v23  ;;  %v650_v22 = vmul.f32 2.0, %v282_v16  ;;  %v374_v29 = vpop.f32.mrf.mxu1 }
  0xe8   :  { %v1141_v24 = vpop.eup %1140  ;;  %948 = vst [vmem:[%s1920_s5 + $0x30] sm:$0xff] %v1139_v17  ;;  %1144 = vpow2.f32 %v908_v13  ;;  %v860_v33 = vmul.f32 1.442695, %v801_v14  ;;  %v725_v34 = vsub.f32 %v625_v2, %v675_v15  ;;  %v651_v35 = vmul.f32 2.0, %v374_v29  ;;  %v558_v17 = vpop.permute.xlu1 %557 }
  0xe9   :  { %949 = vst [vmem:[%s1920_s5 + $0x38] sm:$0xff] %v1141_v24  ;;  %1146 = vpow2.f32 %v858_v18  ;;  %v772_v36 = vmax.f32 %v722_v19, 0.0  ;;  %v700_v37 = vsub.f32 %v600_v7, %v650_v22  ;;  %v605_v11 = vadd.f32 %v1630_v31, %v1619_v26 }
  0xea   :  { %1148 = vpow2.f32 %v860_v33  ;;  %v775_v39 = vmax.f32 %v725_v34, 0.0  ;;  %v701_v41 = vsub.f32 %v601_v12, %v651_v35  ;;  %v626_v16 = vadd.f32 %v1632_v32, %v553_v51 }
  0xeb   :  { %v824_v43 = vmul.f32 %v1643_v45, %v772_v36  ;;  %v750_v20 = vmax.f32 %v700_v37, 0.0  ;;  %v629_v33 = vadd.f32 %v1630_v31, %v558_v17 }
  0xec   :  { %v827_v46 = vmul.f32 %v1643_v45, %v775_v39  ;;  %v751_v47 = vmax.f32 %v701_v41, 0.0  ;;  %v318_v48 = vpop.f32.mrf.mxu2 }
  0xed   :  { %v1143_v49 = vpop.eup %1142  ;;  %v906_v52 = vmul.f32 1.442695, %v824_v43  ;;  %v802_v53 = vmul.f32 %v1643_v45, %v750_v20  ;;  %v674_v54 = vmul.f32 2.0, %v318_v48  ;;  %v413_v21 = vpop.f32.mrf.mxu3 }
  0xee   :  { %v1145_v55 = vpop.eup %1144  ;;  %972 = vst [vmem:[%s1920_s5 + $0xf0] sm:$0xff] %v1143_v49  ;;  %v912_v57 = vmul.f32 1.442695, %v827_v46  ;;  %v803_v58 = vmul.f32 %v1643_v45, %v751_v47  ;;  %v677_v59 = vmul.f32 2.0, %v413_v21  ;;  %v285_v60 = vpop.f32.mrf.mxu0  ;;  %v607_v21 = vadd.f32 %v1630_v31, %v1621_v27 }
  0xef   :  { %v1147_v61 = vpop.eup %1146  ;;  %975 = vst [vmem:[%s1920_s5 + $0x108] sm:$0xff] %v1145_v55  ;;  %1150 = vpow2.f32 %v906_v52  ;;  %v862_v25 = vmul.f32 1.442695, %v802_v53  ;;  %v724_v62 = vsub.f32 %v624_v42, %v674_v54  ;;  %v652_v63 = vmul.f32 2.0, %v285_v60  ;;  %v377_v0 = vpop.f32.mrf.mxu1 }
  0xf0   :  { %v1149_v1 = vpop.eup %1148  ;;  %950 = vst [vmem:[%s1920_s5 + $0x40] sm:$0xff] %v1147_v61  ;;  %1152 = vpow2.f32 %v912_v57  ;;  %v864_v2 = vmul.f32 1.442695, %v803_v58  ;;  %v727_v3 = vsub.f32 %v627_v56, %v677_v59  ;;  %v653_v4 = vmul.f32 2.0, %v377_v0  ;;  %v563_v59 = vpop.permute.xlu2 %562 }
  0xf1   :  { %951 = vst [vmem:[%s1920_s5 + $0x48] sm:$0xff] %v1149_v1  ;;  %1154 = vpow2.f32 %v862_v25  ;;  %v774_v5 = vmax.f32 %v724_v62, 0.0  ;;  %v702_v6 = vsub.f32 %v602_v44, %v652_v63  ;;  %v606_v54 = vadd.f32 %v1632_v32, %v1621_v27 }
  0xf2   :  { %1156 = vpow2.f32 %v864_v2  ;;  %v777_v7 = vmax.f32 %v727_v3, 0.0  ;;  %v703_v8 = vsub.f32 %v603_v50, %v653_v4  ;;  %v628_v60 = vadd.f32 %v1632_v32, %v558_v17 }
  0xf3   :  { %v826_v9 = vmul.f32 %v1643_v45, %v774_v5  ;;  %v752_v23 = vmax.f32 %v702_v6, 0.0  ;;  %v631_v1 = vadd.f32 %v1630_v31, %v563_v59 }
  0xf4   :  { %v829_v12 = vmul.f32 %v1643_v45, %v777_v7  ;;  %v753_v13 = vmax.f32 %v703_v8, 0.0  ;;  %v321_v14 = vpop.f32.mrf.mxu2 }
  0xf5   :  { %v1151_v15 = vpop.eup %1150  ;;  %v910_v18 = vmul.f32 1.442695, %v826_v9  ;;  %v804_v19 = vmul.f32 %v1643_v45, %v752_v23  ;;  %v676_v22 = vmul.f32 2.0, %v321_v14  ;;  %v416_v29 = vpop.f32.mrf.mxu3 }
  0xf6   :  { %v1153_v24 = vpop.eup %1152  ;;  %974 = vst [vmem:[%s1920_s5 + $0x100] sm:$0xff] %v1151_v15  ;;  %v916_v26 = vmul.f32 1.442695, %v829_v12  ;;  %v805_v34 = vmul.f32 %v1643_v45, %v753_v13  ;;  %v679_v35 = vmul.f32 2.0, %v416_v29  ;;  %v288_v36 = vpop.f32.mrf.mxu0 }
  0xf7   :  { %v1155_v37 = vpop.eup %1154  ;;  %977 = vst [vmem:[%s1920_s5 + $0x118] sm:$0xff] %v1153_v24  ;;  %1158 = vpow2.f32 %v910_v18  ;;  %v866_v39 = vmul.f32 1.442695, %v804_v19  ;;  %v726_v41 = vsub.f32 %v626_v16, %v676_v22  ;;  %v654_v42 = vmul.f32 2.0, %v288_v36  ;;  %v380_v43 = vpop.f32.mrf.mxu1 }
  0xf8   :  { %v1157_v20 = vpop.eup %1156  ;;  %952 = vst [vmem:[%s1920_s5 + $0x50] sm:$0xff] %v1155_v37  ;;  %1160 = vpow2.f32 %v916_v26  ;;  %v868_v44 = vmul.f32 1.442695, %v805_v34  ;;  %v729_v46 = vsub.f32 %v629_v33, %v679_v35  ;;  %v655_v47 = vmul.f32 2.0, %v380_v43  ;;  %v568_v34 = vpop.permute.xlu0 %567 }
  0xf9   :  { %953 = vst [vmem:[%s1920_s5 + $0x58] sm:$0xff] %v1157_v20  ;;  %1162 = vpow2.f32 %v866_v39  ;;  %v776_v48 = vmax.f32 %v726_v41, 0.0  ;;  %v704_v49 = vsub.f32 %v604_v10, %v654_v42  ;;  %v608_v19 = vadd.f32 %v1632_v32, %v1623_v28 }
  0xfa   :  { %1164 = vpow2.f32 %v868_v44  ;;  %v779_v50 = vmax.f32 %v729_v46, 0.0  ;;  %v705_v51 = vsub.f32 %v605_v11, %v655_v47  ;;  %v609_v22 = vadd.f32 %v1630_v31, %v1623_v28 }
  0xfb   :  { %v828_v52 = vmul.f32 %v1643_v45, %v776_v48  ;;  %v754_v53 = vmax.f32 %v704_v49, 0.0  ;;  %v630_v35 = vadd.f32 %v1632_v32, %v563_v59  ;;  %v633_v43 = vadd.f32 %v1630_v31, %v568_v34  ;;  %v573_v59 = vpop.permute.xlu1 %572 }
  0xfc   :  { %v831_v55 = vmul.f32 %v1643_v45, %v779_v50  ;;  %v755_v56 = vmax.f32 %v705_v51, 0.0  ;;  %v324_v57 = vpop.f32.mrf.mxu2 }
  0xfd   :  { %v1159_v58 = vpop.eup %1158  ;;  %v914_v61 = vmul.f32 1.442695, %v828_v52  ;;  %v806_v25 = vmul.f32 %v1643_v45, %v754_v53  ;;  %v678_v62 = vmul.f32 2.0, %v324_v57  ;;  %v419_v63 = vpop.f32.mrf.mxu3 }
  0xfe   :  { %v1161_v0 = vpop.eup %1160  ;;  %976 = vst [vmem:[%s1920_s5 + $0x110] sm:$0xff] %v1159_v58  ;;  %v920_v27 = vmul.f32 1.442695, %v831_v55  ;;  %v807_v2 = vmul.f32 %v1643_v45, %v755_v56  ;;  %v681_v3 = vmul.f32 2.0, %v419_v63  ;;  %v291_v4 = vpop.f32.mrf.mxu0 }
  0xff   :  { %v1163_v5 = vpop.eup %1162  ;;  %979 = vst [vmem:[%s1920_s5 + $0x128] sm:$0xff] %v1161_v0  ;;  %1166 = vpow2.f32 %v914_v61  ;;  %v870_v6 = vmul.f32 1.442695, %v806_v25  ;;  %v728_v7 = vsub.f32 %v628_v60, %v678_v62  ;;  %v656_v8 = vmul.f32 2.0, %v291_v4  ;;  %v383_v9 = vpop.f32.mrf.mxu1 }
 0x100   :  { %v1165_v23 = vpop.eup %1164  ;;  %954 = vst [vmem:[%s1920_s5 + $0x60] sm:$0xff] %v1163_v5  ;;  %1168 = vpow2.f32 %v920_v27  ;;  %v872_v10 = vmul.f32 1.442695, %v807_v2  ;;  %v731_v11 = vsub.f32 %v631_v1, %v681_v3  ;;  %v657_v12 = vmul.f32 2.0, %v383_v9 }
 0x101   :  { %955 = vst [vmem:[%s1920_s5 + $0x68] sm:$0xff] %v1165_v23  ;;  %1170 = vpow2.f32 %v870_v6  ;;  %v778_v13 = vmax.f32 %v728_v7, 0.0  ;;  %v706_v14 = vsub.f32 %v606_v54, %v656_v8  ;;  %v610_v25 = vadd.f32 %v1632_v32, %v1628_v30 }
 0x102   :  { %1172 = vpow2.f32 %v872_v10  ;;  %v781_v15 = vmax.f32 %v731_v11, 0.0  ;;  %v707_v16 = vsub.f32 %v607_v21, %v657_v12  ;;  %v611_v62 = vadd.f32 %v1630_v31, %v1628_v30 }
 0x103   :  { %v830_v17 = vmul.f32 %v1643_v45, %v778_v13  ;;  %v756_v18 = vmax.f32 %v706_v14, 0.0  ;;  %v632_v2 = vadd.f32 %v1632_v32, %v568_v34  ;;  %v635_v8 = vadd.f32 %v1630_v31, %v573_v59 }
 0x104   :  { %v833_v29 = vmul.f32 %v1643_v45, %v781_v15  ;;  %v757_v24 = vmax.f32 %v707_v16, 0.0  ;;  %v327_v33 = vpop.f32.mrf.mxu2 }
 0x105   :  { %v1167_v26 = vpop.eup %1166  ;;  %v918_v36 = vmul.f32 1.442695, %v830_v17  ;;  %v808_v37 = vmul.f32 %v1643_v45, %v756_v18  ;;  %v680_v39 = vmul.f32 2.0, %v327_v33  ;;  %v422_v41 = vpop.f32.mrf.mxu3 }
 0x106   :  { %v1169_v42 = vpop.eup %1168  ;;  %978 = vst [vmem:[%s1920_s5 + $0x120] sm:$0xff] %v1167_v26  ;;  %v924_v28 = vmul.f32 1.442695, %v833_v29  ;;  %v809_v20 = vmul.f32 %v1643_v45, %v757_v24  ;;  %v683_v44 = vmul.f32 2.0, %v422_v41  ;;  %v294_v46 = vpop.f32.mrf.mxu0 }
 0x107   :  { %v1171_v47 = vpop.eup %1170  ;;  %981 = vst [vmem:[%s1920_s5 + $0x138] sm:$0xff] %v1169_v42  ;;  %1174 = vpow2.f32 %v918_v36  ;;  %v874_v48 = vmul.f32 1.442695, %v808_v37  ;;  %v730_v49 = vsub.f32 %v630_v35, %v680_v39  ;;  %v658_v50 = vmul.f32 2.0, %v294_v46  ;;  %v386_v51 = vpop.f32.mrf.mxu1 }
 0x108   :  { %v1173_v52 = vpop.eup %1172  ;;  %956 = vst [vmem:[%s1920_s5 + $0x70] sm:$0xff] %v1171_v47  ;;  %1176 = vpow2.f32 %v924_v28  ;;  %v876_v53 = vmul.f32 1.442695, %v809_v20  ;;  %v733_v54 = vsub.f32 %v633_v43, %v683_v44  ;;  %v659_v21 = vmul.f32 2.0, %v386_v51  ;;  %v578_v26 = vpop.permute.xlu2 %577 }
 0x109   :  { %957 = vst [vmem:[%s1920_s5 + $0x78] sm:$0xff] %v1173_v52  ;;  %1178 = vpow2.f32 %v874_v48  ;;  %v780_v55 = vmax.f32 %v730_v49, 0.0  ;;  %v708_v56 = vsub.f32 %v608_v19, %v658_v50  ;;  %v612_v36 = vadd.f32 %v1632_v32, %v1636_v38 }
 0x10a   :  { %1180 = vpow2.f32 %v876_v53  ;;  %v783_v57 = vmax.f32 %v733_v54, 0.0  ;;  %v709_v58 = vsub.f32 %v609_v22, %v659_v21  ;;  %v613_v37 = vadd.f32 %v1630_v31, %v1636_v38 }
 0x10b   :  { %v832_v60 = vmul.f32 %v1643_v45, %v780_v55  ;;  %v758_v61 = vmax.f32 %v708_v56, 0.0  ;;  %v634_v28 = vadd.f32 %v1632_v32, %v573_v59  ;;  %v637_v49 = vadd.f32 %v1630_v31, %v578_v26 }
 0x10c   :  { %v835_v63 = vmul.f32 %v1643_v45, %v783_v57  ;;  %v759_v0 = vmax.f32 %v709_v58, 0.0  ;;  %v330_v1 = vpop.f32.mrf.mxu2 }
 0x10d   :  { %v1175_v27 = vpop.eup %1174  ;;  %v922_v3 = vmul.f32 1.442695, %v832_v60  ;;  %v810_v4 = vmul.f32 %v1643_v45, %v758_v61  ;;  %v682_v5 = vmul.f32 2.0, %v330_v1  ;;  %v425_v6 = vpop.f32.mrf.mxu3 }
 0x10e   :  { %v1177_v7 = vpop.eup %1176  ;;  %980 = vst [vmem:[%s1920_s5 + $0x130] sm:$0xff] %v1175_v27  ;;  %v928_v30 = vmul.f32 1.442695, %v835_v63  ;;  %v811_v9 = vmul.f32 %v1643_v45, %v759_v0  ;;  %v685_v23 = vmul.f32 2.0, %v425_v6  ;;  %v297_v10 = vpop.f32.mrf.mxu0  ;;  %v636_v6 = vadd.f32 %v1632_v32, %v578_v26 }
 0x10f   :  { %v1179_v11 = vpop.eup %1178  ;;  %983 = vst [vmem:[%s1920_s5 + $0x148] sm:$0xff] %v1177_v7  ;;  %1182 = vpow2.f32 %v922_v3  ;;  %v878_v12 = vmul.f32 1.442695, %v810_v4  ;;  %v732_v13 = vsub.f32 %v632_v2, %v682_v5  ;;  %v660_v14 = vmul.f32 2.0, %v297_v10  ;;  %v389_v15 = vpop.f32.mrf.mxu1 }
 0x110   :  { %v1181_v16 = vpop.eup %1180  ;;  %958 = vst [vmem:[%s1920_s5 + $0x80] sm:$0xff] %v1179_v11  ;;  %1184 = vpow2.f32 %v928_v30  ;;  %v880_v17 = vmul.f32 1.442695, %v811_v9  ;;  %v735_v18 = vsub.f32 %v635_v8, %v685_v23  ;;  %v661_v19 = vmul.f32 2.0, %v389_v15  ;;  %v583_v0 = vpop.permute.xlu0 %582 }
 0x111   :  { %959 = vst [vmem:[%s1920_s5 + $0x88] sm:$0xff] %v1181_v16  ;;  %1186 = vpow2.f32 %v878_v12  ;;  %v782_v22 = vmax.f32 %v732_v13, 0.0  ;;  %v710_v29 = vsub.f32 %v610_v25, %v660_v14  ;;  %v639_v10 = vadd.f32 %v1630_v31, %v583_v0 }
 0x112   :  { %1188 = vpow2.f32 %v880_v17  ;;  %v785_v24 = vmax.f32 %v735_v18, 0.0  ;;  %v711_v33 = vsub.f32 %v611_v62, %v661_v19  ;;  %v615_v15 = vadd.f32 %v1630_v31, %v1638_v40 }
 0x113   :  { %v834_v34 = vmul.f32 %v1643_v45, %v782_v22  ;;  %v760_v35 = vmax.f32 %v710_v29, 0.0 }
 0x114   :  { %v837_v39 = vmul.f32 %v1643_v45, %v785_v24  ;;  %v761_v41 = vmax.f32 %v711_v33, 0.0  ;;  %v333_v42 = vpop.f32.mrf.mxu2 }
 0x115   :  { %v1183_v43 = vpop.eup %1182  ;;  %v926_v20 = vmul.f32 1.442695, %v834_v34  ;;  %v812_v44 = vmul.f32 %v1643_v45, %v760_v35  ;;  %v684_v46 = vmul.f32 2.0, %v333_v42  ;;  %v428_v47 = vpop.f32.mrf.mxu3 }
 0x116   :  { %v1185_v48 = vpop.eup %1184  ;;  %982 = vst [vmem:[%s1920_s5 + $0x140] sm:$0xff] %v1183_v43  ;;  %v932_v38 = vmul.f32 1.442695, %v837_v39  ;;  %v813_v50 = vmul.f32 %v1643_v45, %v761_v41  ;;  %v687_v51 = vmul.f32 2.0, %v428_v47  ;;  %v300_v52 = vpop.f32.mrf.mxu0  ;;  %v638_v39 = vadd.f32 %v1632_v32, %v583_v0 }
 0x117   :  { %v1187_v53 = vpop.eup %1186  ;;  %985 = vst [vmem:[%s1920_s5 + $0x158] sm:$0xff] %v1185_v48  ;;  %1190 = vpow2.f32 %v926_v20  ;;  %v882_v54 = vmul.f32 1.442695, %v812_v44  ;;  %v734_v21 = vsub.f32 %v634_v28, %v684_v46  ;;  %v662_v55 = vmul.f32 2.0, %v300_v52  ;;  %v392_v56 = vpop.f32.mrf.mxu1 }
 0x118   :  { %v1189_v57 = vpop.eup %1188  ;;  %960 = vst [vmem:[%s1920_s5 + $0x90] sm:$0xff] %v1187_v53  ;;  %1192 = vpow2.f32 %v932_v38  ;;  %v884_v58 = vmul.f32 1.442695, %v813_v50  ;;  %v737_v59 = vsub.f32 %v637_v49, %v687_v51  ;;  %v663_v60 = vmul.f32 2.0, %v392_v56 }
 0x119   :  { %961 = vst [vmem:[%s1920_s5 + $0x98] sm:$0xff] %v1189_v57  ;;  %1194 = vpow2.f32 %v882_v54  ;;  %v784_v61 = vmax.f32 %v734_v21, 0.0  ;;  %v712_v25 = vsub.f32 %v612_v36, %v662_v55 }
 0x11a   :  { %1196 = vpow2.f32 %v884_v58  ;;  %v787_v62 = vmax.f32 %v737_v59, 0.0  ;;  %v713_v63 = vsub.f32 %v613_v37, %v663_v60 }
 0x11b   :  { %v836_v1 = vmul.f32 %v1643_v45, %v784_v61  ;;  %v762_v27 = vmax.f32 %v712_v25, 0.0 }
 0x11c   :  { %v839_v2 = vmul.f32 %v1643_v45, %v787_v62  ;;  %v763_v3 = vmax.f32 %v713_v63, 0.0  ;;  %v336_v4 = vpop.f32.mrf.mxu2 }
 0x11d   :  { %v1191_v5 = vpop.eup %1190  ;;  %v930_v7 = vmul.f32 1.442695, %v836_v1  ;;  %v814_v8 = vmul.f32 %v1643_v45, %v762_v27  ;;  %v686_v30 = vmul.f32 2.0, %v336_v4  ;;  %v431_v9 = vpop.f32.mrf.mxu3 }
 0x11e   :  { %v1193_v23 = vpop.eup %1192  ;;  %984 = vst [vmem:[%s1920_s5 + $0x150] sm:$0xff] %v1191_v5  ;;  %v936_v11 = vmul.f32 1.442695, %v839_v2  ;;  %v815_v12 = vmul.f32 %v1643_v45, %v763_v3  ;;  %v689_v13 = vmul.f32 2.0, %v431_v9 }
 0x11f   :  { %v1195_v14 = vpop.eup %1194  ;;  %987 = vst [vmem:[%s1920_s5 + $0x168] sm:$0xff] %v1193_v23  ;;  %1198 = vpow2.f32 %v930_v7  ;;  %v886_v16 = vmul.f32 1.442695, %v814_v8  ;;  %v736_v17 = vsub.f32 %v636_v6, %v686_v30  ;;  %v395_v18 = vpop.f32.mrf.mxu1 }
 0x120   :  { %v1197_v19 = vpop.eup %1196  ;;  %962 = vst [vmem:[%s1920_s5 + $0xa0] sm:$0xff] %v1195_v14  ;;  %1200 = vpow2.f32 %v936_v11  ;;  %v888_v22 = vmul.f32 1.442695, %v815_v12  ;;  %v739_v29 = vsub.f32 %v639_v10, %v689_v13  ;;  %v665_v24 = vmul.f32 2.0, %v395_v18 }
 0x121   :  { %963 = vst [vmem:[%s1920_s5 + $0xa8] sm:$0xff] %v1197_v19  ;;  %1202 = vpow2.f32 %v886_v16  ;;  %v786_v31 = vmax.f32 %v736_v17, 0.0 }
 0x122   :  { %1204 = vpow2.f32 %v888_v22  ;;  %v789_v40 = vmax.f32 %v739_v29, 0.0  ;;  %v715_v33 = vsub.f32 %v615_v15, %v665_v24 }
 0x123   :  { %v838_v26 = vmul.f32 %v1643_v45, %v786_v31 }
 0x124   :  { %v841_v34 = vmul.f32 %v1643_v45, %v789_v40  ;;  %v765_v35 = vmax.f32 %v715_v33, 0.0  ;;  %v339_v36 = vpop.f32.mrf.mxu2 }
 0x125   :  { %v1199_v37 = vpop.eup %1198  ;;  %v934_v41 = vmul.f32 1.442695, %v838_v26  ;;  %v688_v42 = vmul.f32 2.0, %v339_v36 }
 0x126   :  { %v1201_v43 = vpop.eup %1200  ;;  %986 = vst [vmem:[%s1920_s5 + $0x160] sm:$0xff] %v1199_v37  ;;  %v940_v28 = vmul.f32 1.442695, %v841_v34  ;;  %v817_v20 = vmul.f32 %v1643_v45, %v765_v35 }
 0x127   :  { %v1203_v44 = vpop.eup %1202  ;;  %989 = vst [vmem:[%s1920_s5 + $0x178] sm:$0xff] %v1201_v43  ;;  %1206 = vpow2.f32 %v934_v41  ;;  %v738_v46 = vsub.f32 %v638_v39, %v688_v42 }
 0x128   :  { %v1205_v47 = vpop.eup %1204  ;;  %964 = vst [vmem:[%s1920_s5 + $0xb0] sm:$0xff] %v1203_v44  ;;  %1208 = vpow2.f32 %v940_v28  ;;  %v892_v32 = vmul.f32 1.442695, %v817_v20 }
 0x129   :  { %965 = vst [vmem:[%s1920_s5 + $0xb8] sm:$0xff] %v1205_v47  ;;  %v788_v48 = vmax.f32 %v738_v46, 0.0 }
 0x12a   :  { %1210 = vpow2.f32 %v892_v32 }
 0x12b   :  { %v840_v49 = vmul.f32 %v1643_v45, %v788_v48 }
 0x12d   :  { %v1207_v38 = vpop.eup %1206  ;;  %v938_v50 = vmul.f32 1.442695, %v840_v49 }
 0x12e   :  { %v1209_v51 = vpop.eup %1208  ;;  %988 = vst [vmem:[%s1920_s5 + $0x170] sm:$0xff] %v1207_v38 }
 0x12f   :  { %991 = vst [vmem:[%s1920_s5 + $0x188] sm:$0xff] %v1209_v51  ;;  %1212 = vpow2.f32 %v938_v50 }
 0x130   :  { %v1211_v52 = vpop.eup %1210 }
 0x131   :  { %967 = vst [vmem:[%s1920_s5 + $0xc8] sm:$0xff] %v1211_v52 }
 0x135   :  { %v1213_v53 = vpop.eup %1212 }
 0x136   :  { %990 = vst [vmem:[%s1920_s5 + $0x180] sm:$0xff] %v1213_v53 }

</bundles_post_ra>
